<compile_context>
chip_gen: v7x
topology: tpu7x:2x2x1
jax: 0.10.0
libtpu: 0.0.40
codegen_flags: <defaults>
</compile_context>

<pallas_src>
import math

import jax
import jax.numpy as jnp
from jax.experimental import pallas as pl
from jax.experimental.pallas import tpu as pltpu


_LANE = 128

# Generation-aware block sizing: keep 3 arrays x 2 buffers x block well inside
# the scoped-VMEM budget.
#   v5e/v6e (128 MiB physical VMEM): 4 MiB blocks -> 24 MiB working set
#   v7x     ( 64 MiB physical VMEM): 2 MiB blocks -> 12 MiB working set
try:
    _VMEM_PHYS = getattr(pltpu.get_tpu_info(), "vmem_capacity_bytes",
                         64 * 1024 * 1024)
except Exception:  # unknown backend / interpret mode
    _VMEM_PHYS = 64 * 1024 * 1024

if _VMEM_PHYS >= 128 * 1024 * 1024:
    _BLOCK_BYTES = 4 * 1024 * 1024
    _VMEM_LIMIT = 64 * 1024 * 1024
else:
    _BLOCK_BYTES = 2 * 1024 * 1024
    _VMEM_LIMIT = 32 * 1024 * 1024


# ------------------------------ Pallas kernel ------------------------------

def _quant_add_kernel(p_ref, x_ref, y_ref, o_ref):
    # p_ref (SMEM, f32[3]): [scale, 1/scale, clip_val_effective]
    scale = p_ref[0]
    inv_scale = p_ref[1]
    clip = p_ref[2]

    def pact_quant(v):
        # clamp(v, 0, clip_val) -> linear_quantize (floor) -> dequantize
        vf = v.astype(jnp.float32)
        c = jnp.clip(vf, 0.0, clip)
        dq = jnp.floor(c * scale) * inv_scale
        # torch.nan_to_num: NaN inputs propagate through clamp/floor, so zero
        # them based on the original input.
        return jnp.where(jnp.isnan(vf), 0.0, dq)

    out = pact_quant(x_ref[...]) + pact_quant(y_ref[...])
    o_ref[...] = out.astype(o_ref.dtype)


# ------------------------------ jitted wrapper ------------------------------

@jax.jit
def _quant_add_call(params, x, y):
    orig_shape = x.shape
    dtype = x.dtype
    itemsize = jnp.dtype(dtype).itemsize
    total = x.size                               # static under jit

    # dtype-aware sublane multiple: 8 (f32) / 16 (bf16/f16) / 32 (int8/fp8)
    sub = max(8, 32 // itemsize)
    rows = pl.cdiv(total, _LANE)
    rows = ((rows + sub - 1) // sub) * sub
    padded = rows * _LANE

    aligned = (padded == total)
    if aligned:
        # Fast path: zero extra HBM passes outside the kernel.
        xf = x.reshape(rows, _LANE)
        yf = y.reshape(rows, _LANE)
    else:
        xf = jnp.pad(x.reshape(-1), (0, padded - total)).reshape(rows, _LANE)
        yf = jnp.pad(y.reshape(-1), (0, padded - total)).reshape(rows, _LANE)

    max_tile_rows = _BLOCK_BYTES // (_LANE * itemsize)   # multiple of `sub`
    tile_rows = min(max_tile_rows, rows)
    grid = (pl.cdiv(rows, tile_rows),)    # partial last block handled by Pallas

    bytes_accessed = 3 * padded * itemsize               # x, y, out
    out2d = pl.pallas_call(
        _quant_add_kernel,
        out_shape=jax.ShapeDtypeStruct((rows, _LANE), dtype),
        grid=grid,
        in_specs=[
            pl.BlockSpec(memory_space=pltpu.MemorySpace.SMEM),     # scalars
            pl.BlockSpec((tile_rows, _LANE), lambda i: (i, 0)),    # x tile
            pl.BlockSpec((tile_rows, _LANE), lambda i: (i, 0)),    # y tile
        ],
        out_specs=pl.BlockSpec((tile_rows, _LANE), lambda i: (i, 0)),
        compiler_params=pltpu.CompilerParams(
            dimension_semantics=("parallel",),
            vmem_limit_bytes=_VMEM_LIMIT,
        ),
        cost_estimate=pl.CostEstimate(
            flops=16 * padded, transcendentals=0,
            bytes_accessed=bytes_accessed),
    )(params, xf, yf)

    if aligned:
        return out2d.reshape(orig_shape)
    return out2d.reshape(-1)[:total].reshape(orig_shape)


# ------------------------------ module wrapper ------------------------------

class QuantAddPallas:
    """JAX/Pallas port of QuantAdd.forward (inference path)."""

    def __init__(self, abits, clip_val=None, *, round_pow2=True, max_inp_val=6.0):
        bits = [abits] if isinstance(abits, int) else list(abits)
        self.abits = bits
        # QuantPaCTActiv: alpha_activ filled with 0.01 (requires_grad=False)
        # => argmax == 0 => one_hot selects branch 0 only.
        num_bits = bits[0]
        n_levels = 2.0 ** num_bits - 1.0
        cv = float(max_inp_val if clip_val is None else clip_val)
        scale = n_levels / cv
        if round_pow2:
            # STE forward rounds the scale to a power of two and writes the
            # matching clip value back into clip_val (idempotent across calls).
            scale = 2.0 ** math.floor(math.log2(scale))
            cv = n_levels / scale
        self.scale = scale
        self.clip_val = cv
        # Staged once (device-resident after first call), not per call.
        self._params = jnp.array([scale, 1.0 / scale, cv], dtype=jnp.float32)

    def __call__(self, x, y):
        assert x.shape == y.shape and x.dtype == y.dtype
        return _quant_add_call(self._params, x, y)


# --------------------------------- test -------------------------------------

def _ref_quant_add(x, y, scale, clip):
    """Pure-JAX reference of QuantAdd.forward (math in f32)."""
    def q(v):
        vf = v.astype(jnp.float32)
        dq = jnp.floor(jnp.clip(vf, 0.0, clip) * scale) / scale
        return jnp.where(jnp.isnan(vf), 0.0, dq)
    return q(x) + q(y)


if __name__ == "__main__":
    key = jax.random.PRNGKey(0)
    kx, ky = jax.random.split(key)

    mod = QuantAddPallas(abits=8, clip_val=None, round_pow2=True)

    # --- test 1: f32, aligned NCHW activations (fast path, no pad/slice) ---
    N, C, H, W = 2, 4, 16, 16
    # Scale inputs so both the 0-clip and the upper clip actually engage.
    x = 4.0 * jax.random.normal(kx, (N, C, H, W), dtype=jnp.float32)
    y = 4.0 * jax.random.normal(ky, (N, C, H, W), dtype=jnp.float32)
    # Exercise nan_to_num / clamp-of-inf paths.
    x = x.at[0, 0, 0, 0].set(jnp.nan)
    y = y.at[1, 3, 5, 7].set(jnp.inf)

    out = jax.block_until_ready(mod(x, y))
    ref = _ref_quant_add(x, y, mod.scale, mod.clip_val)
    assert out.shape == (N, C, H, W), out.shape
    assert bool(jnp.all(jnp.isfinite(out))), "non-finite values leaked through"
    assert jnp.allclose(out, ref, atol=1e-6, rtol=1e-6)

    # --- test 2: bf16, unaligned shape (pad path + dtype-correct store) ---
    kx2, ky2 = jax.random.split(jax.random.PRNGKey(1))
    xb = (4.0 * jax.random.normal(kx2, (3, 5, 7), dtype=jnp.float32)).astype(jnp.bfloat16)
    yb = (4.0 * jax.random.normal(ky2, (3, 5, 7), dtype=jnp.float32)).astype(jnp.bfloat16)
    outb = jax.block_until_ready(mod(xb, yb))
    refb = _ref_quant_add(xb, yb, mod.scale, mod.clip_val).astype(jnp.bfloat16)
    assert outb.dtype == jnp.bfloat16 and outb.shape == (3, 5, 7)
    assert jnp.allclose(outb.astype(jnp.float32), refb.astype(jnp.float32),
                        atol=1e-2, rtol=1e-2)

    # TODO(synk): multi-bit-width QuantPaCTActiv branch selection is resolved
    # host-side (alpha_activ is frozen at 0.01 => branch 0); a learnable
    # argmax-in-kernel path is not implemented.
    print("KERNEL_OK")
</pallas_src>

<mosaic_0001>
module attributes {stable_mosaic.version = 11 : i64} {
  func.func @_quant_add_kernel(%arg0: i32, %arg1: memref<3xf32, #tpu.memory_space<smem>>, %arg2: memref<16x128xf32, #tpu.memory_space<vmem>>, %arg3: memref<16x128xf32, #tpu.memory_space<vmem>>, %arg4: memref<16x128xf32, #tpu.memory_space<vmem>>) attributes {dimension_semantics = [#tpu.dimension_semantics<parallel>], iteration_bounds = array<i64: 1>, scalar_prefetch = 0 : i64, scratch_operands = 0 : i64, tpu.core_type = #tpu.core_type<tc>, window_params = [{transform_indices = @transform_0, window_bounds = array<i64: 3>}, {transform_indices = @transform_1, window_bounds = array<i64: 16, 128>}, {transform_indices = @transform_2, window_bounds = array<i64: 16, 128>}, {transform_indices = @transform_3, window_bounds = array<i64: 16, 128>}]} {
    %c0 = arith.constant 0 : index
    %0 = memref.load %arg1[%c0] : memref<3xf32, #tpu.memory_space<smem>>
    %c1 = arith.constant 1 : index
    %1 = memref.load %arg1[%c1] : memref<3xf32, #tpu.memory_space<smem>>
    %c2 = arith.constant 2 : index
    %2 = memref.load %arg1[%c2] : memref<3xf32, #tpu.memory_space<smem>>
    %c0_0 = arith.constant 0 : index
    %c0_1 = arith.constant 0 : index
    %3 = vector.load %arg2[%c0_0, %c0_1] : memref<16x128xf32, #tpu.memory_space<vmem>>, vector<16x128xf32>
    %cst = arith.constant 0.000000e+00 : f32
    %4 = vector.broadcast %cst : f32 to vector<16x128xf32>
    %5 = arith.maximumf %4, %3 : vector<16x128xf32>
    %6 = vector.broadcast %2 : f32 to vector<16x128xf32>
    %7 = arith.minimumf %6, %5 : vector<16x128xf32>
    %8 = vector.broadcast %0 : f32 to vector<16x128xf32>
    %9 = arith.mulf %7, %8 : vector<16x128xf32>
    %10 = math.floor %9 : vector<16x128xf32>
    %11 = vector.broadcast %1 : f32 to vector<16x128xf32>
    %12 = arith.mulf %10, %11 : vector<16x128xf32>
    %13 = arith.cmpf one, %3, %3 : vector<16x128xf32>
    %cst_2 = arith.constant 0.000000e+00 : f32
    %14 = vector.broadcast %cst_2 : f32 to vector<16x128xf32>
    %15 = arith.select %13, %14, %12 : vector<16x128xi1>, vector<16x128xf32>
    %c0_3 = arith.constant 0 : index
    %c0_4 = arith.constant 0 : index
    %16 = vector.load %arg3[%c0_3, %c0_4] : memref<16x128xf32, #tpu.memory_space<vmem>>, vector<16x128xf32>
    %cst_5 = arith.constant 0.000000e+00 : f32
    %17 = vector.broadcast %cst_5 : f32 to vector<16x128xf32>
    %18 = arith.maximumf %17, %16 : vector<16x128xf32>
    %19 = vector.broadcast %2 : f32 to vector<16x128xf32>
    %20 = arith.minimumf %19, %18 : vector<16x128xf32>
    %21 = vector.broadcast %0 : f32 to vector<16x128xf32>
    %22 = arith.mulf %20, %21 : vector<16x128xf32>
    %23 = math.floor %22 : vector<16x128xf32>
    %24 = vector.broadcast %1 : f32 to vector<16x128xf32>
    %25 = arith.mulf %23, %24 : vector<16x128xf32>
    %26 = arith.cmpf one, %16, %16 : vector<16x128xf32>
    %cst_6 = arith.constant 0.000000e+00 : f32
    %27 = vector.broadcast %cst_6 : f32 to vector<16x128xf32>
    %28 = arith.select %26, %27, %25 : vector<16x128xi1>, vector<16x128xf32>
    %29 = arith.addf %15, %28 : vector<16x128xf32>
    %c0_7 = arith.constant 0 : index
    %c0_8 = arith.constant 0 : index
    %30 = vector.load %arg4[%c0_7, %c0_8] : memref<16x128xf32, #tpu.memory_space<vmem>>, vector<16x128xf32>
    tpu.vector_store %arg4[%c0_7, %c0_8], %29 {strides = array<i32>} : memref<16x128xf32, #tpu.memory_space<vmem>>, vector<16x128xf32>,
    return
  }
  func.func @transform_0(%arg0: i32) -> i32 {
    %c0_i32 = arith.constant 0 : i32
    %c0_i32_0 = arith.constant 0 : i32
    return %c0_i32 : i32
  }
  func.func @transform_1(%arg0: i32) -> (i32, i32) {
    %c0_i32 = arith.constant 0 : i32
    %c0_i32_0 = arith.constant 0 : i32
    return %arg0, %c0_i32 : i32, i32
  }
  func.func @transform_2(%arg0: i32) -> (i32, i32) {
    %c0_i32 = arith.constant 0 : i32
    %c0_i32_0 = arith.constant 0 : i32
    return %arg0, %c0_i32 : i32, i32
  }
  func.func @transform_3(%arg0: i32) -> (i32, i32) {
    %c0_i32 = arith.constant 0 : i32
    %c0_i32_0 = arith.constant 0 : i32
    return %arg0, %c0_i32 : i32, i32
  }
}

</mosaic_0001>

<bundles_post_ra>
// kernel: _quant_add_call.1
= control target key start
LH: loop header
LB: loop body
LE: loop exit
PB: predicated region body
PF: predicated region fallthrough
CT: control target
= control target key end

     0   :  { %8 = vsyncpa [#allocation3], 0  ;;  %s133_s0 = inlined_call_operand.vmem [shape: f32[3], index: 0, kind: input, shape index: {}]   ;;  %s134_s1 = inlined_call_operand.vmem [shape: f32[16,128], index: 1, kind: input, shape index: {}]   ;;  %s135_s2 = inlined_call_operand.vmem [shape: f32[16,128], index: 2, kind: input, shape index: {}]   ;;  %s136_s3 = inlined_call_operand.vmem [shape: f32[16,128], index: 3, kind: output, shape index: {}]  }
   0x1   :  { %s15_s14 = sshll.u32 %s133_s0, 4  ;;  %s16_s14 = int_to_ptr.vmem [resolvable:$true] %s15_s14 }
   0x2   :  { %s77_s15 = scalar_lea.vmem %s16_s14, 16  ;;  %p82_p1 = scmp.lt.s32.totalorder %s16_s14, %s16_s14 }
   0x3   :  { %p78_p0 = scmp.ne.s32.totalorder %s16_s14, %s77_s15  ;;  %p83_p2 = scmp.lt.s32.totalorder %s77_s15, %s77_s15 }
   0x5   :  { %p84_p3 = por %p83_p2, %p82_p1 }
   0x7   :  { %p85_p4 = pnand %p84_p3, %p78_p0 }
   0x9   :  { %88 = shalt.err (!%p85_p4)
}
   0xa   :  { %s91_s16 = smov [#allocation2]  }
   0xb   :  { %18 = dma.vmem_to_smem %s16_s14, 16, %s91_s16, [#allocation3]  }
   0xc   :  { %89 = dma.done.wait [#allocation3], 16  }
   0xd   :  { %90 = vsyncadd [#allocation3], 4294967280 }
   0xe   :  { %26 = sfence }
   0xf   :  { %s27_s17 = sld [smem:[#allocation2]]  ;;  %v30_v0 = vld [vmem:[%s134_s1] sm:$0xff]  ;;  %s75_s20 = sld [smem:[#allocation2 + $0x2]]  ;;  %v31_v2 = vld [vmem:[%s134_s1 + $0x8] sm:$0xff] }
  0x10   :  { %v49_v1 = vld [vmem:[%s135_s2] sm:$0xff]  ;;  %v50_v3 = vld [vmem:[%s135_s2 + $0x8] sm:$0xff]  ;;  %s74_s26 = sld [smem:[#allocation2 + $0x1]]  ;;  %v32_v4 = vmax.f32 %v30_v0, 0.0  ;;  %v33_v6 = vmax.f32 %v31_v2, 0.0  ;;  %vm45_vm0 = vcmp.ne.f32.partialorder %v30_v0, %v30_v0  ;;  %vm46_vm2 = vcmp.ne.f32.partialorder %v31_v2, %v31_v2 }
  0x11   :  { %v51_v5 = vmax.f32 %v49_v1, 0.0  ;;  %v52_v7 = vmax.f32 %v50_v3, 0.0  ;;  %vm61_vm1 = vcmp.ne.f32.partialorder %v49_v1, %v49_v1  ;;  %vm62_vm3 = vcmp.ne.f32.partialorder %v50_v3, %v50_v3 }
  0x15   :  { %v34_v8 = vstv %s75_s20  ;;  %v37_v9 = vstv %s27_s17 }
  0x16   :  { %v35_v10 = vmin.f32 %v34_v8, %v32_v4  ;;  %v53_v11 = vmin.f32 %v34_v8, %v51_v5  ;;  %v36_v12 = vmin.f32 %v34_v8, %v33_v6  ;;  %v54_v13 = vmin.f32 %v34_v8, %v52_v7 }
  0x17   :  { %v42_v18 = vstv %s74_s26 }
  0x18   :  { %v38_v14 = vmul.f32 %v37_v9, %v35_v10  ;;  %v55_v15 = vmul.f32 %v53_v11, %v37_v9  ;;  %v39_v16 = vmul.f32 %v37_v9, %v36_v12  ;;  %v56_v17 = vmul.f32 %v54_v13, %v37_v9 }
  0x1a   :  { %v40_v19 = vfloor.f32 %v38_v14  ;;  %v57_v20 = vfloor.f32 %v55_v15  ;;  %v41_v21 = vfloor.f32 %v39_v16  ;;  %v58_v22 = vfloor.f32 %v56_v17 }
  0x1c   :  { %v43_v23 = vmul.f32 %v42_v18, %v40_v19  ;;  %v59_v24 = vmul.f32 %v57_v20, %v42_v18  ;;  %v44_v25 = vmul.f32 %v42_v18, %v41_v21  ;;  %v60_v26 = vmul.f32 %v58_v22, %v42_v18 }
  0x1e   :  { %v47_v27 = vsel %vm45_vm0, 0.0, %v43_v23  ;;  %v63_v28 = vsel %vm61_vm1, 0.0, %v59_v24  ;;  %v48_v29 = vsel %vm46_vm2, 0.0, %v44_v25  ;;  %v64_v30 = vsel %vm62_vm3, 0.0, %v60_v26 }
  0x1f   :  { %v65_v31 = vadd.f32 %v63_v28, %v47_v27  ;;  %v66_v32 = vadd.f32 %v64_v30, %v48_v29 }
  0x21   :  { %67 = vst [vmem:[%s136_s3] sm:$0xff] %v65_v31  ;;  %68 = vst [vmem:[%s136_s3 + $0x8] sm:$0xff] %v66_v32 }
  0x22   :  { %73 = vsyncpa [#allocation3], 1 }

</bundles_post_ra>
